<compile_context>
chip_gen: v7x
topology: tpu7x:2x2x1
jax: 0.10.0
libtpu: 0.0.40
codegen_flags: <defaults>
</compile_context>

<pallas_src>
import jax
import jax.numpy as jnp
from jax import lax
from jax.experimental import pallas as pl
from jax.experimental.pallas import tpu as pltpu


def sdpa_kernel(x1_ref, x2t_ref, w_ref, o_ref):
    # x1_ref : [tm, K] bf16        (M-tile of the query-like operand)
    # x2t_ref: [K, N]  bf16        (pre-scaled by w1, pre-transposed, resident)
    # w_ref  : [N, D]  bf16        (resident "value" matrix)
    # o_ref  : [tm, D] fp32

    # scores = (x1 * 1) @ (w1 * x2).T  == ((x1 @ x2.T) * w1), fp32 accumulation.
    s = jnp.dot(x1_ref[...], x2t_ref[...],
                preferred_element_type=jnp.float32)        # [tm, N] fp32

    # Numerically-stable softmax, normalization deferred past the second matmul.
    m = jnp.max(s, axis=-1, keepdims=True)
    e = jnp.exp(s - m)                                     # fp32, unnormalized
    denom = jnp.sum(e, axis=-1, keepdims=True)             # [tm, 1] fp32

    # dropout (inference mode) == identity
    # TODO(synk): training-mode dropout with p=w2 not reproduced.

    # unnormalized @ w on the MXU (bf16 operands, fp32 accumulation), then
    # normalize the small [tm, D] accumulator with an EUP reciprocal.
    acc = jnp.dot(e.astype(jnp.bfloat16), w_ref[...],
                  preferred_element_type=jnp.float32)      # [tm, D] fp32
    o_ref[...] = (acc * pl.reciprocal(denom, approx=True)).astype(o_ref.dtype)


def _pick_tm(M):
    """Per-generation M-tile: fill the MXU, keep >=2 grid steps on dual-TC v7x."""
    try:
        kind = jax.devices()[0].device_kind.lower()
    except Exception:
        kind = ""
    if "v7" in kind:
        if M >= 512 and M % 256 == 0:
            return 256                      # 2+ full-MXU tiles per TC
        if M >= 256 and M % 128 == 0:
            return 128                      # grid >= 2 -> both TCs busy
    else:
        # v5e / v6e: single TensorCore -> bigger tile = fewer serial grid steps.
        if M % 256 == 0:
            return 256
    if M % 128 == 0:
        return 128
    return M                                # small / odd M: one full-M tile


def sdpa_pallas(x1, x2, w1, w_val, *, tm=None):
    M, K = x1.shape
    N, K2 = x2.shape
    assert K == K2
    N2, D = w_val.shape
    assert N == N2

    if tm is None:
        tm = _pick_tm(M)
    tm = min(tm, M)
    assert M % tm == 0, "M must be a multiple of the M-tile size"

    # One-time wrapper-side prep (done in XLA, outside the grid loop):
    #  - bf16 casts of all matmul operands (halves DMA bytes / VMEM residency)
    #  - fold the scalar score scale w1 into the resident x2 operand
    #  - pre-transpose x2 to [K, N] so the kernel does a plain contraction
    x1_bf = x1.astype(jnp.bfloat16)
    x2t_bf = (x2 * jnp.float32(w1)).astype(jnp.bfloat16).T      # [K, N]
    w_bf = w_val.astype(jnp.bfloat16)

    grid = (M // tm,)
    return pl.pallas_call(
        sdpa_kernel,
        out_shape=jax.ShapeDtypeStruct((M, D), jnp.float32),
        grid=grid,
        in_specs=[
            pl.BlockSpec((tm, K), lambda i: (i, 0)),   # x1 M-tile
            pl.BlockSpec((K, N), lambda i: (0, 0)),    # x2.T * w1 (resident)
            pl.BlockSpec((N, D), lambda i: (0, 0)),    # w        (resident)
        ],
        out_specs=pl.BlockSpec((tm, D), lambda i: (i, 0)),
        compiler_params=pltpu.CompilerParams(
            dimension_semantics=("parallel",),
        ),
    )(x1_bf, x2t_bf, w_bf)


def sdpa_ref(x1, x2, w1, w_val):
    # Pure-JAX reference using the same mixed-precision policy as the kernel
    # (bf16 matmul operands, fp32 accumulation and fp32 softmax).
    a = x1.astype(jnp.bfloat16)
    b = (x2 * jnp.float32(w1)).astype(jnp.bfloat16)
    s = lax.dot_general(
        a, b,
        dimension_numbers=(((1,), (1,)), ((), ())),
        preferred_element_type=jnp.float32,
    )
    p = jax.nn.softmax(s, axis=-1)
    return jnp.dot(
        p.astype(jnp.bfloat16),
        w_val.astype(jnp.bfloat16),
        preferred_element_type=jnp.float32,
    )


if __name__ == "__main__":
    # Small but lane-dense shapes consistent with the module's forward:
    #   x1: [M, K], x2: [N, K], w1: scalar scale, w2: dropout p, w: [N, D]
    M, N, K, D = 256, 128, 128, 128

    key = jax.random.PRNGKey(0)
    k1, k2, k3 = jax.random.split(key, 3)
    x1 = jax.random.normal(k1, (M, K), dtype=jnp.float32)
    x2 = jax.random.normal(k2, (N, K), dtype=jnp.float32)
    w_val = jax.random.normal(k3, (N, D), dtype=jnp.float32)  # stand-in for global `w`
    w1 = 2.0     # scale (matches the reference global w1)
    w2 = 1       # dropout p (unused: inference-mode dropout == identity)

    out = sdpa_pallas(x1, x2, w1, w_val)
    out = jax.block_until_ready(out)

    ref = sdpa_ref(x1, x2, w1, w_val)
    assert out.shape == (M, D)
    # tolerance accounts for approx reciprocal, deferred normalization order,
    # and MXU vs XLA accumulation order
    assert jnp.allclose(out, ref, atol=2e-2, rtol=2e-2), "mismatch vs JAX reference"

    print("KERNEL_OK")
</pallas_src>

<mosaic_0001>
module attributes {stable_mosaic.version = 11 : i64} {
  func.func @sdpa_kernel(%arg0: i32, %arg1: memref<256x128xbf16, #tpu.memory_space<vmem>>, %arg2: memref<128x128xbf16, #tpu.memory_space<vmem>>, %arg3: memref<128x128xbf16, #tpu.memory_space<vmem>>, %arg4: memref<256x128xf32, #tpu.memory_space<vmem>>) attributes {dimension_semantics = [#tpu.dimension_semantics<parallel>], iteration_bounds = array<i64: 1>, scalar_prefetch = 0 : i64, scratch_operands = 0 : i64, tpu.core_type = #tpu.core_type<tc>, window_params = [{transform_indices = @transform_0, window_bounds = array<i64: 256, 128>}, {pipeline_mode = #tpu.pipeline_mode<synchronous>, transform_indices = @transform_1, window_bounds = array<i64: 128, 128>}, {pipeline_mode = #tpu.pipeline_mode<synchronous>, transform_indices = @transform_2, window_bounds = array<i64: 128, 128>}, {transform_indices = @transform_3, window_bounds = array<i64: 256, 128>}]} {
    %c0 = arith.constant 0 : index
    %c0_0 = arith.constant 0 : index
    %0 = vector.load %arg1[%c0, %c0_0] : memref<256x128xbf16, #tpu.memory_space<vmem>>, vector<256x128xbf16>
    %c0_1 = arith.constant 0 : index
    %c0_2 = arith.constant 0 : index
    %1 = vector.load %arg2[%c0_1, %c0_2] : memref<128x128xbf16, #tpu.memory_space<vmem>>, vector<128x128xbf16>
    %cst = arith.constant dense<0.000000e+00> : vector<256x128xf32>
    %2 = tpu.matmul %0, %1, %cst {dimension_numbers = #tpu.dot_dimension_numbers<[1], [0], [0], [1], [0, 0, 1, 1], [], []>} : vector<256x128xbf16>, vector<128x128xbf16>, vector<256x128xf32> -> vector<256x128xf32>
    %cst_3 = arith.constant dense<0xFF800000> : vector<256xf32>
    %3 = vector.multi_reduction <maximumf>, %2, %cst_3 [1] : vector<256x128xf32> to vector<256xf32>
    %4 = vector.shape_cast %3 : vector<256xf32> to vector<256x1xf32>
    %5 = vector.broadcast %4 : vector<256x1xf32> to vector<256x128xf32>
    %6 = arith.subf %2, %5 : vector<256x128xf32>
    %7 = math.exp %6 : vector<256x128xf32>
    %cst_4 = arith.constant dense<0.000000e+00> : vector<256xf32>
    %8 = vector.multi_reduction <add>, %7, %cst_4 [1] : vector<256x128xf32> to vector<256xf32>
    %9 = vector.shape_cast %8 : vector<256xf32> to vector<256x1xf32>
    %10 = arith.truncf %7 : vector<256x128xf32> to vector<256x128xbf16>
    %c0_5 = arith.constant 0 : index
    %c0_6 = arith.constant 0 : index
    %11 = vector.load %arg3[%c0_5, %c0_6] : memref<128x128xbf16, #tpu.memory_space<vmem>>, vector<128x128xbf16>
    %cst_7 = arith.constant dense<0.000000e+00> : vector<256x128xf32>
    %12 = tpu.matmul %10, %11, %cst_7 {dimension_numbers = #tpu.dot_dimension_numbers<[1], [0], [0], [1], [0, 0, 1, 1], [], []>} : vector<256x128xbf16>, vector<128x128xbf16>, vector<256x128xf32> -> vector<256x128xf32>
    %13 = tpu.reciprocal %9 {approx = true} : vector<256x1xf32> -> vector<256x1xf32>
    %14 = vector.broadcast %13 : vector<256x1xf32> to vector<256x128xf32>
    %15 = arith.mulf %12, %14 : vector<256x128xf32>
    %c0_8 = arith.constant 0 : index
    %c0_9 = arith.constant 0 : index
    %16 = vector.load %arg4[%c0_8, %c0_9] : memref<256x128xf32, #tpu.memory_space<vmem>>, vector<256x128xf32>
    tpu.vector_store %arg4[%c0_8, %c0_9], %15 {strides = array<i32>} : memref<256x128xf32, #tpu.memory_space<vmem>>, vector<256x128xf32>,
    return
  }
  func.func @transform_0(%arg0: i32) -> (i32, i32) {
    %c0_i32 = arith.constant 0 : i32
    %c0_i32_0 = arith.constant 0 : i32
    return %arg0, %c0_i32 : i32, i32
  }
  func.func @transform_1(%arg0: i32) -> (i32, i32) {
    %c0_i32 = arith.constant 0 : i32
    %c0_i32_0 = arith.constant 0 : i32
    %c0_i32_1 = arith.constant 0 : i32
    return %c0_i32, %c0_i32_0 : i32, i32
  }
  func.func @transform_2(%arg0: i32) -> (i32, i32) {
    %c0_i32 = arith.constant 0 : i32
    %c0_i32_0 = arith.constant 0 : i32
    %c0_i32_1 = arith.constant 0 : i32
    return %c0_i32, %c0_i32_0 : i32, i32
  }
  func.func @transform_3(%arg0: i32) -> (i32, i32) {
    %c0_i32 = arith.constant 0 : i32
    %c0_i32_0 = arith.constant 0 : i32
    return %arg0, %c0_i32 : i32, i32
  }
}

</mosaic_0001>

<bundles_post_ra>
// kernel: tpu_custom_call.1
= control target key start
LH: loop header
LB: loop body
LE: loop exit
PB: predicated region body
PF: predicated region fallthrough
CT: control target
= control target key end

     0   :  { %8 = vsyncpa [#allocation3], 0  ;;  %s1647_s0 = inlined_call_operand.hbm [shape: bf16[256,128], index: 0, kind: input, shape index: {}]   ;;  %s1648_s1 = inlined_call_operand.hbm [shape: bf16[128,128], index: 1, kind: input, shape index: {}]   ;;  %s1649_s2 = inlined_call_operand.hbm [shape: bf16[128,128], index: 2, kind: input, shape index: {}]   ;;  %s1650_s3 = inlined_call_operand.hbm [shape: f32[256,128], index: 3, kind: output, shape index: {}]  }
   0x1   :  { %9 = vsyncpa [#allocation6], 0 }
   0x2   :  { %10 = vsyncpa [#allocation4], 0  ;;  %s1427_s12 = smov [#allocation5]   ;;  %s1428_s14 = smov [#allocation2]  }
   0x3   :  { %s28_s13 = sshll.u32 %s1427_s12, 4  ;;  %s16_s15 = sshll.u32 %s1428_s14, 4  ;;  %s29_s13 = int_to_ptr.vmem [resolvable:$true] %s28_s13  ;;  %s1455_s15 = int_to_ptr.vmem [resolvable:$true] %s16_s15 }
   0x4   :  { %s1333_s18 = scalar_lea.hbm %s1648_s1, 1024 }
   0x5   :  { %p1334_p0 = scmp.ne.s32.totalorder %s1648_s1, %s1333_s18  ;;  %p1337_p1 = scmp.lt.u32.totalorder %s1333_s18, %s1648_s1 }
   0x7   :  { %p1339_p2 = pnand %p1337_p1, %p1334_p0 }
   0x9   :  { %1342 = shalt.err (!%p1339_p2)
}
   0xa   :  { %s1343_s23 = scalar_lea.vmem %s29_s13, 1024  ;;  %p1348_p4 = scmp.lt.s32.totalorder %s29_s13, %s29_s13 }
   0xb   :  { %p1344_p3 = scmp.ne.s32.totalorder %s29_s13, %s1343_s23  ;;  %p1349_p5 = scmp.lt.s32.totalorder %s1343_s23, %s1343_s23 }
   0xd   :  { %p1350_p6 = por %p1349_p5, %p1348_p4 }
   0xf   :  { %p1351_p7 = pnand %p1350_p6, %p1344_p3 }
  0x11   :  { %1354 = shalt.err (!%p1351_p7)
}
  0x12   :  { %s1429_s24 = smov 64   ;;  %s1430_s25 = smov 4  }
  0x13   :  { %34 = dma.hbm_to_vmem [thread:$0]  %s1648_s1, 1024, %s29_s13, [#allocation6], %s1429_s24, %s1429_s24, %s1430_s25  }
  0x14   :  { %s1355_s30 = scalar_lea.hbm %s1647_s0, 2048 }
  0x15   :  { %p1356_p8 = scmp.ne.s32.totalorder %s1647_s0, %s1355_s30  ;;  %p1359_p9 = scmp.lt.u32.totalorder %s1355_s30, %s1647_s0 }
  0x17   :  { %p1361_p10 = pnand %p1359_p9, %p1356_p8 }
  0x19   :  { %1364 = shalt.err (!%p1361_p10)
}
  0x1a   :  { %s1365_s8 = scalar_lea.vmem %s1455_s15, 2048  ;;  %p1370_p12 = scmp.lt.s32.totalorder %s1455_s15, %s1455_s15 }
  0x1b   :  { %p1366_p11 = scmp.ne.s32.totalorder %s1455_s15, %s1365_s8  ;;  %p1371_p13 = scmp.lt.s32.totalorder %s1365_s8, %s1365_s8 }
  0x1d   :  { %p1372_p0 = por %p1371_p13, %p1370_p12 }
  0x1f   :  { %p1373_p1 = pnand %p1372_p0, %p1366_p11 }
  0x21   :  { %1376 = shalt.err (!%p1373_p1)
}
  0x22   :  { %22 = dma.hbm_to_vmem [thread:$0]  %s1647_s0, 2048, %s1455_s15, [#allocation3], %s1429_s24, %s1429_s24, %s1430_s25  }
  0x23   :  { %s1431_s10 = smov [#allocation7]   ;;  %s1377_s14 = scalar_lea.hbm %s1649_s2, 1024 }
  0x24   :  { %s40_s11 = sshll.u32 %s1431_s10, 4  ;;  %p1378_p2 = scmp.ne.s32.totalorder %s1649_s2, %s1377_s14  ;;  %s41_s11 = int_to_ptr.vmem [resolvable:$true] %s40_s11 }
  0x25   :  { %p1381_p3 = scmp.lt.u32.totalorder %s1377_s14, %s1649_s2 }
  0x27   :  { %p1383_p4 = pnand %p1381_p3, %p1378_p2 }
  0x29   :  { %1386 = shalt.err (!%p1383_p4)
}
  0x2a   :  { %s1387_s20 = scalar_lea.vmem %s41_s11, 1024  ;;  %p1392_p6 = scmp.lt.s32.totalorder %s41_s11, %s41_s11 }
  0x2b   :  { %p1388_p5 = scmp.ne.s32.totalorder %s41_s11, %s1387_s20  ;;  %p1393_p7 = scmp.lt.s32.totalorder %s1387_s20, %s1387_s20 }
  0x2d   :  { %p1394_p8 = por %p1393_p7, %p1392_p6 }
  0x2f   :  { %p1395_p9 = pnand %p1394_p8, %p1388_p5 }
  0x31   :  { %1398 = shalt.err (!%p1395_p9)
}
  0x32   :  { %46 = dma.hbm_to_vmem [thread:$0]  %s1649_s2, 1024, %s41_s11, [#allocation6], %s1429_s24, %s1429_s24, %s1430_s25  }
  0x33   :  { %1421 = dma.done.wait [#allocation3], 2048  }
  0x34   :  { %1422 = vsyncadd [#allocation3], 4294965248 }
  0x35   :  { %1423 = dma.done.wait [#allocation6], 2048  }
  0x36   :  { %1424 = vsyncadd [#allocation6], 4294965248  ;;  %v1173_v0 = vld [vmem:[#allocation5] sm:$0xff]   ;;  %v1174_v1 = vld [vmem:[#allocation5 + $0x8] sm:$0xff]   ;;  %s1432_s2 = smov [#allocation8]  }
  0x37   :  { %1069 = vmatprep.subr.bf16.mxu0 %v1173_v0  ;;  %v1175_v2 = vld [vmem:[#allocation5 + $0x10] sm:$0xff]   ;;  %v1176_v3 = vld [vmem:[#allocation5 + $0x18] sm:$0xff]   ;;  %v1181_v4 = vld [vmem:[#allocation2] sm:$0xff]   ;;  %s976_s21 = sshll.u32 %s1432_s2, 4  ;;  %s977_s21 = int_to_ptr.vmem [resolvable:$true] %s976_s21 }
  0x38   :  { %1070 = vmatpush3.bf16.msra.mxu0 %v1173_v0  ;;  %1085 = vmatprep.mubr.bf16.mxu0 %v1181_v4  ;;  %v1177_v5 = vld [vmem:[#allocation5 + $0x20] sm:$0xff]   ;;  %v1178_v6 = vld [vmem:[#allocation5 + $0x28] sm:$0xff]   ;;  %v1179_v7 = vld [vmem:[#allocation5 + $0x30] sm:$0xff]   ;;  %s1399_s22 = scalar_lea.vmem %s977_s21, 4096  ;;  %p1404_p11 = scmp.lt.s32.totalorder %s977_s21, %s977_s21 }
  0x39   :  { %1071 = vmatprep.subr.bf16.mxu0 %v1174_v1  ;;  %v1180_v8 = vld [vmem:[#allocation5 + $0x38] sm:$0xff]   ;;  %v1182_v9 = vld [vmem:[#allocation2 + $0x8] sm:$0xff]   ;;  %v1183_v10 = vld [vmem:[#allocation2 + $0x10] sm:$0xff]   ;;  %p1400_p10 = scmp.ne.s32.totalorder %s977_s21, %s1399_s22  ;;  %p1405_p12 = scmp.lt.s32.totalorder %s1399_s22, %s1399_s22 }
  0x3a   :  { %v1184_v11 = vld [vmem:[#allocation2 + $0x18] sm:$0xff]   ;;  %v1185_v12 = vld [vmem:[#allocation2 + $0x20] sm:$0xff]   ;;  %v1186_v13 = vld [vmem:[#allocation2 + $0x28] sm:$0xff]  }
  0x3b   :  { %v1187_v14 = vld [vmem:[#allocation2 + $0x30] sm:$0xff]   ;;  %v1188_v15 = vld [vmem:[#allocation2 + $0x38] sm:$0xff]   ;;  %v1189_v16 = vld [vmem:[#allocation2 + $0x40] sm:$0xff]   ;;  %p1406_p13 = por %p1405_p12, %p1404_p11 }
  0x3c   :  { %1072 = vmatpush3.bf16.msra.mxu0 %v1174_v1  ;;  %v1190_v17 = vld [vmem:[#allocation2 + $0x48] sm:$0xff]   ;;  %v1191_v18 = vld [vmem:[#allocation2 + $0x50] sm:$0xff]   ;;  %v1192_v19 = vld [vmem:[#allocation2 + $0x58] sm:$0xff]  }
  0x3d   :  { %1073 = vmatprep.subr.bf16.mxu0 %v1175_v2  ;;  %v1193_v20 = vld [vmem:[#allocation2 + $0x60] sm:$0xff]   ;;  %v1194_v21 = vld [vmem:[#allocation2 + $0x68] sm:$0xff]   ;;  %v1195_v22 = vld [vmem:[#allocation2 + $0x70] sm:$0xff]   ;;  %p1407_p0 = pnand %p1406_p13, %p1400_p10 }
  0x3e   :  { %v1196_v23 = vld [vmem:[#allocation2 + $0x78] sm:$0xff]   ;;  %v1197_v24 = vld [vmem:[#allocation7] sm:$0xff]   ;;  %v1198_v25 = vld [vmem:[#allocation7 + $0x8] sm:$0xff]  }
  0x3f   :  { %1117 = vmatprep.subr.bf16.mxu1 %v1197_v24  ;;  %v1199_v26 = vld [vmem:[#allocation7 + $0x10] sm:$0xff]   ;;  %v1200_v36 = vld [vmem:[#allocation7 + $0x18] sm:$0xff]   ;;  %v1201_v40 = vld [vmem:[#allocation7 + $0x20] sm:$0xff]  }
  0x40   :  { %1074 = vmatpush3.bf16.msra.mxu0 %v1175_v2  ;;  %1118 = vmatpush3.bf16.msra.mxu1 %v1197_v24  ;;  %v1202_v42 = vld [vmem:[#allocation7 + $0x28] sm:$0xff]   ;;  %v1203_v46 = vld [vmem:[#allocation7 + $0x30] sm:$0xff]   ;;  %v1204_v48 = vld [vmem:[#allocation7 + $0x38] sm:$0xff]  }
  0x41   :  { %1075 = vmatprep.subr.bf16.mxu0 %v1176_v3  ;;  %1119 = vmatprep.subr.bf16.mxu1 %v1198_v25 }
  0x44   :  { %1076 = vmatpush3.bf16.msra.mxu0 %v1176_v3  ;;  %1120 = vmatpush3.bf16.msra.mxu1 %v1198_v25 }
  0x45   :  { %1077 = vmatprep.subr.bf16.mxu0 %v1177_v5  ;;  %1121 = vmatprep.subr.bf16.mxu1 %v1199_v26 }
  0x48   :  { %1078 = vmatpush3.bf16.msra.mxu0 %v1177_v5  ;;  %1122 = vmatpush3.bf16.msra.mxu1 %v1199_v26 }
  0x49   :  { %1079 = vmatprep.subr.bf16.mxu0 %v1178_v6  ;;  %1123 = vmatprep.subr.bf16.mxu1 %v1200_v36 }
  0x4c   :  { %1080 = vmatpush3.bf16.msra.mxu0 %v1178_v6  ;;  %1124 = vmatpush3.bf16.msra.mxu1 %v1200_v36 }
  0x4d   :  { %1081 = vmatprep.subr.bf16.mxu0 %v1179_v7  ;;  %1125 = vmatprep.subr.bf16.mxu1 %v1201_v40 }
  0x50   :  { %1082 = vmatpush3.bf16.msra.mxu0 %v1179_v7  ;;  %1126 = vmatpush3.bf16.msra.mxu1 %v1201_v40 }
  0x51   :  { %1083 = vmatprep.subr.bf16.mxu0 %v1180_v8  ;;  %1127 = vmatprep.subr.bf16.mxu1 %v1202_v42 }
  0x54   :  { %1084 = vmatpush3.bf16.msra.mxu0 %v1180_v8  ;;  %1128 = vmatpush3.bf16.msra.mxu1 %v1202_v42 }
  0x55   :  { %1129 = vmatprep.subr.bf16.mxu1 %v1203_v46 }
  0x57   :  { %1086 = vmatmul.mubr.bf16.vlgmr.msra.gmra.mrb[0].mxu0 %v1182_v9 }
  0x58   :  { %1089 = vmatprep.mubr.bf16.mxu0 %v1183_v10  ;;  %1130 = vmatpush3.bf16.msra.mxu1 %v1203_v46 }
  0x59   :  { %1131 = vmatprep.subr.bf16.mxu1 %v1204_v48 }
  0x5c   :  { %1132 = vmatpush3.bf16.msra.mxu1 %v1204_v48 }
  0x5f   :  { %1090 = vmatmul.mubr.bf16.gmra.mrb[4].mxu0 %v1184_v11 }
  0x60   :  { %1093 = vmatprep.mubr.bf16.mxu0 %v1185_v12 }
  0x67   :  { %1094 = vmatmul.mubr.bf16.gmra.mrb[8].mxu0 %v1186_v13 }
  0x68   :  { %1097 = vmatprep.mubr.bf16.mxu0 %v1187_v14 }
  0x6f   :  { %1098 = vmatmul.mubr.bf16.gmra.mrb[12].mxu0 %v1188_v15 }
  0x70   :  { %1101 = vmatprep.mubr.bf16.mxu0 %v1189_v16 }
  0x77   :  { %1102 = vmatmul.mubr.bf16.gmra.mrb[16].mxu0 %v1190_v17 }
  0x78   :  { %1105 = vmatprep.mubr.bf16.mxu0 %v1191_v18 }
  0x7f   :  { %1106 = vmatmul.mubr.bf16.gmra.mrb[20].mxu0 %v1192_v19 }
  0x80   :  { %1109 = vmatprep.mubr.bf16.mxu0 %v1193_v20 }
  0x87   :  { %1110 = vmatmul.mubr.bf16.gmra.mrb[24].mxu0 %v1194_v21 }
  0x88   :  { %1113 = vmatprep.mubr.bf16.mxu0 %v1195_v22 }
  0x8f   :  { %1114 = vmatmul.mubr.bf16.gmra.mrb[28].mxu0 %v1196_v23 }
 0x12a   :  { %v1507_v27 = vpop.f32.mrb[0].mxu0 }
 0x12b   :  { %414 = vmax.xlane.f32.xlu1 %v1507_v27  ;;  %v1510_v28 = vpop.f32.mrb[1].mxu0 }
 0x12c   :  { %410 = vmax.xlane.f32.xlu0 %v1510_v28  ;;  %v1513_v29 = vpop.f32.mrb[2].mxu0 }
 0x12d   :  { %v1515_v30 = vpop.f32.mrb[3].mxu0 }
 0x12f   :  { %416 = vmax.xlane.f32.xlu1 %v1513_v29 }
 0x130   :  { %412 = vmax.xlane.f32.xlu0 %v1515_v30 }
 0x132   :  { %v1519_v31 = vpop.f32.mrb[4].mxu0 }
 0x133   :  { %v1521_v32 = vpop.f32.mrb[5].mxu0 }
 0x134   :  { %418 = vmax.xlane.f32.xlu0 %v1521_v32  ;;  %v1524_v33 = vpop.f32.mrb[6].mxu0 }
 0x135   :  { %v1526_v34 = vpop.f32.mrb[7].mxu0 }
 0x136   :  { %420 = vmax.xlane.f32.xlu1 %v1526_v34 }
 0x138   :  { %422 = vmax.xlane.f32.xlu0 %v1519_v31 }
 0x13a   :  { %424 = vmax.xlane.f32.xlu1 %v1524_v33  ;;  %v1531_v35 = vpop.f32.mrb[8].mxu0 }
 0x13b   :  { %v1533_v37 = vpop.f32.mrb[9].mxu0 }
 0x13c   :  { %426 = vmax.xlane.f32.xlu0 %v1533_v37  ;;  %v1536_v38 = vpop.f32.mrb[10].mxu0 }
 0x13d   :  { %v1538_v39 = vpop.f32.mrb[11].mxu0 }
 0x13e   :  { %428 = vmax.xlane.f32.xlu1 %v1538_v39 }
 0x140   :  { %430 = vmax.xlane.f32.xlu0 %v1531_v35 }
 0x142   :  { %432 = vmax.xlane.f32.xlu1 %v1536_v38  ;;  %v1543_v41 = vpop.f32.mrb[12].mxu0 }
 0x143   :  { %v1545_v43 = vpop.f32.mrb[13].mxu0 }
 0x144   :  { %434 = vmax.xlane.f32.xlu0 %v1545_v43  ;;  %v1548_v44 = vpop.f32.mrb[14].mxu0 }
 0x145   :  { %v1550_v45 = vpop.f32.mrb[15].mxu0 }
 0x146   :  { %436 = vmax.xlane.f32.xlu1 %v1550_v45 }
 0x148   :  { %438 = vmax.xlane.f32.xlu0 %v1543_v41 }
 0x14a   :  { %440 = vmax.xlane.f32.xlu1 %v1548_v44  ;;  %v1555_v47 = vpop.f32.mrb[16].mxu0 }
 0x14b   :  { %v1557_v49 = vpop.f32.mrb[17].mxu0 }
 0x14c   :  { %442 = vmax.xlane.f32.xlu0 %v1557_v49  ;;  %v1560_v50 = vpop.f32.mrb[18].mxu0 }
 0x14d   :  { %v1562_v51 = vpop.f32.mrb[19].mxu0 }
 0x14e   :  { %444 = vmax.xlane.f32.xlu1 %v1562_v51 }
 0x150   :  { %446 = vmax.xlane.f32.xlu0 %v1555_v47 }
 0x152   :  { %448 = vmax.xlane.f32.xlu1 %v1560_v50  ;;  %v1567_v52 = vpop.f32.mrb[20].mxu0 }
 0x153   :  { %v1569_v53 = vpop.f32.mrb[21].mxu0 }
 0x154   :  { %450 = vmax.xlane.f32.xlu0 %v1569_v53  ;;  %v1572_v54 = vpop.f32.mrb[22].mxu0 }
 0x155   :  { %v1574_v55 = vpop.f32.mrb[23].mxu0 }
 0x156   :  { %452 = vmax.xlane.f32.xlu1 %v1574_v55 }
 0x158   :  { %454 = vmax.xlane.f32.xlu0 %v1567_v52 }
 0x15a   :  { %456 = vmax.xlane.f32.xlu1 %v1572_v54  ;;  %v1579_v56 = vpop.f32.mrb[24].mxu0 }
 0x15b   :  { %v1581_v57 = vpop.f32.mrb[25].mxu0 }
 0x15c   :  { %458 = vmax.xlane.f32.xlu0 %v1581_v57  ;;  %v1584_v58 = vpop.f32.mrb[26].mxu0 }
 0x15d   :  { %v1586_v59 = vpop.f32.mrb[27].mxu0 }
 0x15e   :  { %460 = vmax.xlane.f32.xlu1 %v1586_v59 }
 0x160   :  { %462 = vmax.xlane.f32.xlu0 %v1579_v56 }
 0x162   :  { %464 = vmax.xlane.f32.xlu1 %v1584_v58  ;;  %v1591_v60 = vpop.f32.mrb[28].mxu0 }
 0x163   :  { %v1593_v61 = vpop.f32.mrb[29].mxu0 }
 0x164   :  { %466 = vmax.xlane.f32.xlu0 %v1593_v61  ;;  %v1596_v62 = vpop.f32.mrb[30].mxu0 }
 0x165   :  { %v1598_v63 = vpop.f32.mrb[31].mxu0 }
 0x166   :  { %468 = vmax.xlane.f32.xlu1 %v1598_v63 }
 0x168   :  { %470 = vmax.xlane.f32.xlu0 %v1591_v60 }
 0x16a   :  { %472 = vmax.xlane.f32.xlu1 %v1596_v62 }
 0x1b8   :  { %v415_v0 = vpop.xlane.xlu1 %414 }
 0x1b9   :  { %v476_v1 = vsub.f32 %v1507_v27, %v415_v0  ;;  %v411_v2 = vpop.xlane.xlu0 %410 }
 0x1ba   :  { %v474_v3 = vsub.f32 %v1510_v28, %v411_v2 }
 0x1bb   :  { %v510_v4 = vmul.f32 1.442695, %v476_v1 }
 0x1bc   :  { %v506_v5 = vmul.f32 1.442695, %v474_v3  ;;  %v417_v6 = vpop.xlane.xlu1 %416 }
 0x1bd   :  { %1205 = vpow2.f32 %v510_v4  ;;  %v477_v7 = vsub.f32 %v1513_v29, %v417_v6  ;;  %v413_v8 = vpop.xlane.xlu0 %412 }
 0x1be   :  { %v475_v9 = vsub.f32 %v1515_v30, %v413_v8  ;;  %1207 = vpow2.f32 %v506_v5 }
 0x1bf   :  { %v512_v10 = vmul.f32 1.442695, %v477_v7 }
 0x1c0   :  { %v508_v11 = vmul.f32 1.442695, %v475_v9 }
 0x1c1   :  { %1209 = vpow2.f32 %v512_v10  ;;  %v419_v12 = vpop.xlane.xlu0 %418 }
 0x1c2   :  { %1211 = vpow2.f32 %v508_v11  ;;  %v478_v13 = vsub.f32 %v1521_v32, %v419_v12 }
 0x1c3   :  { %v421_v14 = vpop.xlane.xlu1 %420 }
 0x1c4   :  { %v514_v15 = vmul.f32 1.442695, %v478_v13  ;;  %v479_v16 = vsub.f32 %v1526_v34, %v421_v14 }
 0x1c5   :  { %v423_v17 = vpop.xlane.xlu0 %422 }
 0x1c6   :  { %v516_v18 = vmul.f32 1.442695, %v479_v16  ;;  %v480_v19 = vsub.f32 %v1519_v31, %v423_v17  ;;  %1213 = vpow2.f32 %v514_v15 }
 0x1c7   :  { %v1206_v20 = vpop.eup %1205  ;;  %v425_v21 = vpop.xlane.xlu1 %424 }
 0x1c8   :  { %1215 = vpow2.f32 %v516_v18  ;;  %v518_v22 = vmul.f32 1.442695, %v480_v19  ;;  %v481_v23 = vsub.f32 %v1524_v33, %v425_v21  ;;  %574 = vadd.xlane.f32.xlu0 %v1206_v20  ;;  %v1208_v25 = vpop.eup %1207 }
 0x1c9   :  { %v427_v24 = vpop.xlane.xlu0 %426 }
 0x1ca   :  { %1217 = vpow2.f32 %v518_v22  ;;  %v520_v26 = vmul.f32 1.442695, %v481_v23  ;;  %v482_v27 = vsub.f32 %v1533_v37, %v427_v24 }
 0x1cb   :  { %v1210_v28 = vpop.eup %1209  ;;  %v429_v29 = vpop.xlane.xlu1 %428 }
 0x1cc   :  { %v1212_v30 = vpop.eup %1211  ;;  %1219 = vpow2.f32 %v520_v26  ;;  %v522_v32 = vmul.f32 1.442695, %v482_v27  ;;  %v483_v31 = vsub.f32 %v1538_v39, %v429_v29  ;;  %570 = vadd.xlane.f32.xlu0 %v1208_v25  ;;  %576 = vadd.xlane.f32.xlu1 %v1210_v28  ;;  %v635_v34 = vpack.c.bf16 %v1210_v28, %v1206_v20 }
 0x1cd   :  { %v431_v36 = vpop.xlane.xlu0 %430  ;;  %v634_v40 = vpack.c.bf16 %v1212_v30, %v1208_v25 }
 0x1ce   :  { %v524_v33 = vmul.f32 1.442695, %v483_v31  ;;  %v484_v42 = vsub.f32 %v1531_v35, %v431_v36  ;;  %1221 = vpow2.f32 %v522_v32 }
 0x1cf   :  { %1133 = vmatprep.mubr.bf16.mxu1 %v634_v40  ;;  %v433_v46 = vpop.xlane.xlu1 %432 }
 0x1d0   :  { %1223 = vpow2.f32 %v524_v33  ;;  %v526_v37 = vmul.f32 1.442695, %v484_v42  ;;  %v485_v48 = vsub.f32 %v1536_v38, %v433_v46  ;;  %1134 = vmatmul.mubr.bf16.vlgmr.msra.gmra.mrb[0].mxu1 %v635_v34  ;;  %572 = vadd.xlane.f32.xlu1 %v1212_v30  ;;  %v1214_v0 = vpop.eup %1213 }
 0x1d1   :  { %v435_v1 = vpop.xlane.xlu0 %434 }
 0x1d2   :  { %v1216_v39 = vpop.eup %1215  ;;  %1225 = vpow2.f32 %v526_v37  ;;  %v528_v2 = vmul.f32 1.442695, %v485_v48  ;;  %v486_v3 = vsub.f32 %v1545_v43, %v435_v1 }
 0x1d3   :  { %v437_v4 = vpop.xlane.xlu1 %436  ;;  %v636_v5 = vpack.c.bf16 %v1216_v39, %v1214_v0 }
 0x1d4   :  { %v1218_v6 = vpop.eup %1217  ;;  %1227 = vpow2.f32 %v528_v2  ;;  %v530_v35 = vmul.f32 1.442695, %v486_v3  ;;  %v487_v7 = vsub.f32 %v1550_v45, %v437_v4 }
 0x1d5   :  { %1137 = vmatprep.mubr.bf16.mxu1 %v636_v5  ;;  %v439_v8 = vpop.xlane.xlu0 %438  ;;  %582 = vadd.xlane.f32.xlu0 %v1218_v6 }
 0x1d6   :  { %v1220_v38 = vpop.eup %1219  ;;  %v532_v9 = vmul.f32 1.442695, %v487_v7  ;;  %v488_v10 = vsub.f32 %v1543_v41, %v439_v8  ;;  %1229 = vpow2.f32 %v530_v35 }
 0x1d7   :  { %v441_v11 = vpop.xlane.xlu1 %440  ;;  %584 = vadd.xlane.f32.xlu1 %v1220_v38  ;;  %v637_v12 = vpack.c.bf16 %v1220_v38, %v1218_v6 }
 0x1d8   :  { %1231 = vpow2.f32 %v532_v9  ;;  %v534_v43 = vmul.f32 1.442695, %v488_v10  ;;  %v489_v13 = vsub.f32 %v1548_v44, %v441_v11  ;;  %v1222_v14 = vpop.eup %1221 }
 0x1d9   :  { %1138 = vmatmul.mubr.bf16.gmra.mrb[4].mxu1 %v637_v12  ;;  %v443_v15 = vpop.xlane.xlu0 %442  ;;  %578 = vadd.xlane.f32.xlu0 %v1214_v0 }
 0x1da   :  { %v1224_v45 = vpop.eup %1223  ;;  %1233 = vpow2.f32 %v534_v43  ;;  %v536_v16 = vmul.f32 1.442695, %v489_v13  ;;  %v490_v17 = vsub.f32 %v1557_v49, %v443_v15 }
 0x1db   :  { %v445_v18 = vpop.xlane.xlu1 %444  ;;  %580 = vadd.xlane.f32.xlu1 %v1216_v39  ;;  %v638_v41 = vpack.c.bf16 %v1224_v45, %v1222_v14 }
 0x1dc   :  { %v1226_v19 = vpop.eup %1225  ;;  %1235 = vpow2.f32 %v536_v16  ;;  %v538_v20 = vmul.f32 1.442695, %v490_v17  ;;  %v491_v21 = vsub.f32 %v1562_v51, %v445_v18 }
 0x1dd   :  { %1141 = vmatprep.mubr.bf16.mxu1 %v638_v41  ;;  %v447_v22 = vpop.xlane.xlu0 %446  ;;  %590 = vadd.xlane.f32.xlu0 %v1226_v19 }
 0x1de   :  { %v1228_v44 = vpop.eup %1227  ;;  %v540_v23 = vmul.f32 1.442695, %v491_v21  ;;  %v492_v24 = vsub.f32 %v1555_v47, %v447_v22  ;;  %1237 = vpow2.f32 %v538_v20 }
 0x1df   :  { %v449_v25 = vpop.xlane.xlu1 %448  ;;  %592 = vadd.xlane.f32.xlu1 %v1228_v44  ;;  %v639_v26 = vpack.c.bf16 %v1228_v44, %v1226_v19 }
 0x1e0   :  { %1239 = vpow2.f32 %v540_v23  ;;  %v542_v49 = vmul.f32 1.442695, %v492_v24  ;;  %v493_v27 = vsub.f32 %v1560_v50, %v449_v25  ;;  %v1230_v28 = vpop.eup %1229 }
 0x1e1   :  { %1142 = vmatmul.mubr.bf16.gmra.mrb[8].mxu1 %v639_v26  ;;  %v451_v29 = vpop.xlane.xlu0 %450  ;;  %586 = vadd.xlane.f32.xlu0 %v1222_v14 }
 0x1e2   :  { %v1232_v51 = vpop.eup %1231  ;;  %1241 = vpow2.f32 %v542_v49  ;;  %v544_v30 = vmul.f32 1.442695, %v493_v27  ;;  %v494_v32 = vsub.f32 %v1569_v53, %v451_v29 }
 0x1e3   :  { %v453_v31 = vpop.xlane.xlu1 %452  ;;  %588 = vadd.xlane.f32.xlu1 %v1224_v45  ;;  %v640_v47 = vpack.c.bf16 %v1232_v51, %v1230_v28 }
 0x1e4   :  { %v1234_v34 = vpop.eup %1233  ;;  %1243 = vpow2.f32 %v544_v30  ;;  %v546_v36 = vmul.f32 1.442695, %v494_v32  ;;  %v495_v40 = vsub.f32 %v1574_v55, %v453_v31 }
 0x1e5   :  { %1145 = vmatprep.mubr.bf16.mxu1 %v640_v47  ;;  %v455_v33 = vpop.xlane.xlu0 %454  ;;  %598 = vadd.xlane.f32.xlu0 %v1234_v34 }
 0x1e6   :  { %v1236_v50 = vpop.eup %1235  ;;  %v548_v42 = vmul.f32 1.442695, %v495_v40  ;;  %v496_v46 = vsub.f32 %v1567_v52, %v455_v33  ;;  %1245 = vpow2.f32 %v546_v36 }
 0x1e7   :  { %v457_v37 = vpop.xlane.xlu1 %456  ;;  %600 = vadd.xlane.f32.xlu1 %v1236_v50  ;;  %v641_v48 = vpack.c.bf16 %v1236_v50, %v1234_v34 }
 0x1e8   :  { %1247 = vpow2.f32 %v548_v42  ;;  %v550_v53 = vmul.f32 1.442695, %v496_v46  ;;  %v497_v0 = vsub.f32 %v1572_v54, %v457_v37  ;;  %v1238_v1 = vpop.eup %1237 }
 0x1e9   :  { %1146 = vmatmul.mubr.bf16.gmra.mrb[12].mxu1 %v641_v48  ;;  %v459_v39 = vpop.xlane.xlu0 %458  ;;  %594 = vadd.xlane.f32.xlu0 %v1230_v28 }
 0x1ea   :  { %v1240_v55 = vpop.eup %1239  ;;  %1249 = vpow2.f32 %v550_v53  ;;  %v552_v2 = vmul.f32 1.442695, %v497_v0  ;;  %v498_v3 = vsub.f32 %v1581_v57, %v459_v39 }
 0x1eb   :  { %v461_v4 = vpop.xlane.xlu1 %460  ;;  %596 = vadd.xlane.f32.xlu1 %v1232_v51  ;;  %v642_v52 = vpack.c.bf16 %v1240_v55, %v1238_v1 }
 0x1ec   :  { %v1242_v5 = vpop.eup %1241  ;;  %1251 = vpow2.f32 %v552_v2  ;;  %v554_v6 = vmul.f32 1.442695, %v498_v3  ;;  %v499_v35 = vsub.f32 %v1586_v59, %v461_v4 }
 0x1ed   :  { %1149 = vmatprep.mubr.bf16.mxu1 %v642_v52  ;;  %v463_v7 = vpop.xlane.xlu0 %462  ;;  %606 = vadd.xlane.f32.xlu0 %v1242_v5 }
 0x1ee   :  { %v1244_v54 = vpop.eup %1243  ;;  %v556_v8 = vmul.f32 1.442695, %v499_v35  ;;  %v500_v38 = vsub.f32 %v1579_v56, %v463_v7  ;;  %1253 = vpow2.f32 %v554_v6 }
 0x1ef   :  { %v465_v9 = vpop.xlane.xlu1 %464  ;;  %608 = vadd.xlane.f32.xlu1 %v1244_v54  ;;  %v643_v10 = vpack.c.bf16 %v1244_v54, %v1242_v5 }
 0x1f0   :  { %1255 = vpow2.f32 %v556_v8  ;;  %v558_v57 = vmul.f32 1.442695, %v500_v38  ;;  %v501_v11 = vsub.f32 %v1584_v58, %v465_v9  ;;  %v1246_v12 = vpop.eup %1245 }
 0x1f1   :  { %1150 = vmatmul.mubr.bf16.gmra.mrb[16].mxu1 %v643_v10  ;;  %602 = vadd.xlane.f32.xlu0 %v1238_v1  ;;  %v467_v43 = vpop.xlane.xlu0 %466 }
 0x1f2   :  { %v1248_v59 = vpop.eup %1247  ;;  %1257 = vpow2.f32 %v558_v57  ;;  %v560_v13 = vmul.f32 1.442695, %v501_v11  ;;  %v502_v14 = vsub.f32 %v1593_v61, %v467_v43 }
 0x1f3   :  { %604 = vadd.xlane.f32.xlu1 %v1240_v55  ;;  %v469_v15 = vpop.xlane.xlu1 %468  ;;  %v644_v56 = vpack.c.bf16 %v1248_v59, %v1246_v12 }
 0x1f4   :  { %v1250_v45 = vpop.eup %1249  ;;  %1259 = vpow2.f32 %v560_v13  ;;  %v562_v16 = vmul.f32 1.442695, %v502_v14  ;;  %v503_v17 = vsub.f32 %v1598_v63, %v469_v15 }
 0x1f5   :  { %1153 = vmatprep.mubr.bf16.mxu1 %v644_v56  ;;  %614 = vadd.xlane.f32.xlu0 %v1250_v45  ;;  %v471_v58 = vpop.xlane.xlu0 %470 }
 0x1f6   :  { %v1252_v18 = vpop.eup %1251  ;;  %v564_v41 = vmul.f32 1.442695, %v503_v17  ;;  %v504_v19 = vsub.f32 %v1591_v60, %v471_v58  ;;  %1261 = vpow2.f32 %v562_v16 }
 0x1f7   :  { %616 = vadd.xlane.f32.xlu1 %v1252_v18  ;;  %v473_v20 = vpop.xlane.xlu1 %472  ;;  %v645_v21 = vpack.c.bf16 %v1252_v18, %v1250_v45 }
 0x1f8   :  { %1263 = vpow2.f32 %v564_v41  ;;  %v566_v61 = vmul.f32 1.442695, %v504_v19  ;;  %v505_v22 = vsub.f32 %v1596_v62, %v473_v20  ;;  %v1254_v44 = vpop.eup %1253 }
 0x1f9   :  { %1154 = vmatmul.mubr.bf16.gmra.mrb[20].mxu1 %v645_v21  ;;  %610 = vadd.xlane.f32.xlu0 %v1246_v12 }
 0x1fa   :  { %v1256_v23 = vpop.eup %1255  ;;  %v568_v63 = vmul.f32 1.442695, %v505_v22  ;;  %1265 = vpow2.f32 %v566_v61 }
 0x1fb   :  { %612 = vadd.xlane.f32.xlu1 %v1248_v59  ;;  %v646_v24 = vpack.c.bf16 %v1256_v23, %v1254_v44 }
 0x1fc   :  { %v1258_v25 = vpop.eup %1257  ;;  %1267 = vpow2.f32 %v568_v63 }
 0x1fd   :  { %1157 = vmatprep.mubr.bf16.mxu1 %v646_v24  ;;  %622 = vadd.xlane.f32.xlu0 %v1258_v25 }
 0x1fe   :  { %v1260_v60 = vpop.eup %1259 }
 0x1ff   :  { %624 = vadd.xlane.f32.xlu1 %v1260_v60  ;;  %v647_v26 = vpack.c.bf16 %v1260_v60, %v1258_v25 }
 0x200   :  { %v1262_v49 = vpop.eup %1261 }
 0x201   :  { %1158 = vmatmul.mubr.bf16.gmra.mrb[24].mxu1 %v647_v26  ;;  %618 = vadd.xlane.f32.xlu0 %v1254_v44 }
 0x202   :  { %v1264_v27 = vpop.eup %1263 }
 0x203   :  { %620 = vadd.xlane.f32.xlu1 %v1256_v23  ;;  %v648_v62 = vpack.c.bf16 %v1264_v27, %v1262_v49 }
 0x204   :  { %v1266_v28 = vpop.eup %1265 }
 0x205   :  { %626 = vadd.xlane.f32.xlu0 %v1262_v49  ;;  %1161 = vmatprep.mubr.bf16.mxu1 %v648_v62 }
 0x206   :  { %v1268_v29 = vpop.eup %1267 }
 0x207   :  { %628 = vadd.xlane.f32.xlu1 %v1264_v27  ;;  %v649_v51 = vpack.c.bf16 %v1268_v29, %v1266_v28 }
 0x209   :  { %630 = vadd.xlane.f32.xlu0 %v1266_v28  ;;  %1162 = vmatmul.mubr.bf16.gmra.mrb[28].mxu1 %v649_v51 }
 0x20b   :  { %632 = vadd.xlane.f32.xlu1 %v1268_v29 }
 0x255   :  { %v575_v30 = vpop.xlane.xlu0 %574 }
 0x256   :  { %1269 = vrcp.f32 %v575_v30 }
 0x259   :  { %v577_v32 = vpop.xlane.xlu1 %576  ;;  %v571_v31 = vpop.xlane.xlu0 %570 }
 0x25a   :  { %1271 = vrcp.f32 %v571_v31 }
 0x25b   :  { %1273 = vrcp.f32 %v577_v32 }
 0x25d   :  { %v573_v47 = vpop.xlane.xlu1 %572 }
 0x25e   :  { %1275 = vrcp.f32 %v573_v47 }
 0x260   :  { %v1270_v39 = vpop.eup %1269 }
 0x262   :  { %v583_v34 = vpop.xlane.xlu0 %582 }
 0x263   :  { %1277 = vrcp.f32 %v583_v34 }
 0x264   :  { %v585_v36 = vpop.xlane.xlu1 %584  ;;  %v1272_v2 = vpop.eup %1271 }
 0x265   :  { %v1274_v52 = vpop.eup %1273 }
 0x266   :  { %v579_v40 = vpop.xlane.xlu0 %578 }
 0x267   :  { %1279 = vrcp.f32 %v579_v40 }
 0x268   :  { %v581_v33 = vpop.xlane.xlu1 %580  ;;  %1281 = vrcp.f32 %v585_v36  ;;  %v1276_v7 = vpop.eup %1275 }
 0x269   :  { %1283 = vrcp.f32 %v581_v33 }
 0x26a   :  { %v591_v50 = vpop.xlane.xlu0 %590 }
 0x26b   :  { %1285 = vrcp.f32 %v591_v50 }
 0x26c   :  { %v593_v42 = vpop.xlane.xlu1 %592 }
 0x26d   :  { %v1278_v57 = vpop.eup %1277 }
 0x26e   :  { %v587_v46 = vpop.xlane.xlu0 %586 }
 0x26f   :  { %1287 = vrcp.f32 %v587_v46 }
 0x270   :  { %v589_v37 = vpop.xlane.xlu1 %588  ;;  %1289 = vrcp.f32 %v593_v42 }
 0x271   :  { %v1280_v12 = vpop.eup %1279  ;;  %1291 = vrcp.f32 %v589_v37 }
 0x272   :  { %v599_v48 = vpop.xlane.xlu0 %598  ;;  %v1282_v14 = vpop.eup %1281 }
 0x273   :  { %v1284_v45 = vpop.eup %1283  ;;  %1293 = vrcp.f32 %v599_v48 }
 0x274   :  { %v601_v53 = vpop.xlane.xlu1 %600 }
 0x275   :  { %v1286_v19 = vpop.eup %1285 }
 0x276   :  { %v595_v0 = vpop.xlane.xlu0 %594 }
 0x277   :  { %1295 = vrcp.f32 %v595_v0 }
 0x278   :  { %v597_v1 = vpop.xlane.xlu1 %596  ;;  %1297 = vrcp.f32 %v601_v53 }
 0x279   :  { %v1288_v21 = vpop.eup %1287  ;;  %1299 = vrcp.f32 %v597_v1 }
 0x27a   :  { %v607_v5 = vpop.xlane.xlu0 %606  ;;  %v1290_v44 = vpop.eup %1289 }
 0x27b   :  { %v1292_v24 = vpop.eup %1291  ;;  %1301 = vrcp.f32 %v607_v5 }
 0x27c   :  { %v609_v38 = vpop.xlane.xlu1 %608 }
 0x27d   :  { %v1294_v62 = vpop.eup %1293 }
 0x27e   :  { %v603_v10 = vpop.xlane.xlu0 %602 }
 0x27f   :  { %1303 = vrcp.f32 %v603_v10 }
 0x280   :  { %v605_v43 = vpop.xlane.xlu1 %604  ;;  %1305 = vrcp.f32 %v609_v38 }
 0x281   :  { %v1296_v29 = vpop.eup %1295  ;;  %1307 = vrcp.f32 %v605_v43 }
 0x282   :  { %v615_v18 = vpop.xlane.xlu0 %614  ;;  %v1298_v31 = vpop.eup %1297 }
 0x283   :  { %v1300_v36 = vpop.eup %1299  ;;  %1309 = vrcp.f32 %v615_v18 }
 0x284   :  { %v617_v41 = vpop.xlane.xlu1 %616 }
 0x285   :  { %v1302_v37 = vpop.eup %1301 }
 0x286   :  { %v611_v25 = vpop.xlane.xlu0 %610 }
 0x287   :  { %1311 = vrcp.f32 %v611_v25 }
 0x288   :  { %v613_v27 = vpop.xlane.xlu1 %612  ;;  %1313 = vrcp.f32 %v617_v41 }
 0x289   :  { %v1304_v53 = vpop.eup %1303  ;;  %1315 = vrcp.f32 %v613_v27 }
 0x28a   :  { %v623_v51 = vpop.xlane.xlu0 %622 }
 0x28b   :  { %1317 = vrcp.f32 %v623_v51 }
 0x28c   :  { %v625_v40 = vpop.xlane.xlu1 %624 }
 0x28e   :  { %v619_v46 = vpop.xlane.xlu0 %618 }
 0x28f   :  { %1319 = vrcp.f32 %v619_v46 }
 0x290   :  { %v621_v0 = vpop.xlane.xlu1 %620  ;;  %1321 = vrcp.f32 %v625_v40 }
 0x291   :  { %1323 = vrcp.f32 %v621_v0 }
 0x2a3   :  { %v1135_v55 = vpop.f32.mrb[0].mxu1 }
 0x2a4   :  { %v909_v3 = vmul.f32 %v1270_v39, %v1135_v55  ;;  %v748_v4 = vpop.f32.mrb[1].mxu1  ;;  %v1306_v55 = vpop.eup %1305 }
 0x2a5   :  { %v907_v6 = vmul.f32 %v1272_v2, %v748_v4  ;;  %v1136_v35 = vpop.f32.mrb[2].mxu1  ;;  %v1308_v4 = vpop.eup %1307 }
 0x2a6   :  { %941 = vst [vmem:[#allocation8 + $0x10] sm:$0xff] %v909_v3  ;;  %v910_v54 = vmul.f32 %v1274_v52, %v1136_v35  ;;  %v751_v8 = vpop.f32.mrb[3].mxu1  ;;  %v627_v35 = vpop.xlane.xlu0 %626 }
 0x2a7   :  { %939 = vst [vmem:[#allocation8] sm:$0xff] %v907_v6  ;;  %v908_v9 = vmul.f32 %v1276_v7, %v751_v8  ;;  %v629_v7 = vpop.xlane.xlu1 %628 }
 0x2a8   :  { %942 = vst [vmem:[#allocation8 + $0x18] sm:$0xff] %v910_v54  ;;  %v1310_v54 = vpop.eup %1309 }
 0x2a9   :  { %940 = vst [vmem:[#allocation8 + $0x8] sm:$0xff] %v908_v9  ;;  %v1312_v38 = vpop.eup %1311 }
 0x2ac   :  { %v1139_v11 = vpop.f32.mrb[4].mxu1 }
 0x2ad   :  { %v913_v59 = vmul.f32 %v1278_v57, %v1139_v11  ;;  %v764_v13 = vpop.f32.mrb[5].mxu1  ;;  %v1314_v57 = vpop.eup %1313 }
 0x2ae   :  { %v911_v15 = vmul.f32 %v1280_v12, %v764_v13  ;;  %v1140_v56 = vpop.f32.mrb[6].mxu1  ;;  %v1316_v43 = vpop.eup %1315 }
 0x2af   :  { %945 = vst [vmem:[#allocation8 + $0x30] sm:$0xff] %v913_v59  ;;  %v914_v16 = vmul.f32 %v1282_v14, %v1140_v56  ;;  %v767_v17 = vpop.f32.mrb[7].mxu1  ;;  %v631_v59 = vpop.xlane.xlu0 %630 }
 0x2b0   :  { %943 = vst [vmem:[#allocation8 + $0x20] sm:$0xff] %v911_v15  ;;  %v912_v58 = vmul.f32 %v1284_v45, %v767_v17  ;;  %v633_v56 = vpop.xlane.xlu1 %632  ;;  %1325 = vrcp.f32 %v631_v59  ;;  %v1318_v45 = vpop.eup %1317 }
 0x2b1   :  { %946 = vst [vmem:[#allocation8 + $0x38] sm:$0xff] %v914_v16  ;;  %1327 = vrcp.f32 %v627_v35  ;;  %v1320_v17 = vpop.eup %1319 }
 0x2b2   :  { %944 = vst [vmem:[#allocation8 + $0x28] sm:$0xff] %v912_v58  ;;  %1329 = vrcp.f32 %v633_v56  ;;  %v1322_v41 = vpop.eup %1321 }
 0x2b3   :  { %1331 = vrcp.f32 %v629_v7 }
 0x2b4   :  { %v1143_v20 = vpop.f32.mrb[8].mxu1 }
 0x2b5   :  { %v917_v61 = vmul.f32 %v1286_v19, %v1143_v20  ;;  %v780_v22 = vpop.f32.mrb[9].mxu1 }
 0x2b6   :  { %v915_v23 = vmul.f32 %v1288_v21, %v780_v22  ;;  %v1144_v63 = vpop.f32.mrb[10].mxu1  ;;  %v1324_v21 = vpop.eup %1323 }
 0x2b7   :  { %949 = vst [vmem:[#allocation8 + $0x50] sm:$0xff] %v917_v61  ;;  %v918_v60 = vmul.f32 %v1290_v44, %v1144_v63  ;;  %v783_v26 = vpop.f32.mrb[11].mxu1 }
 0x2b8   :  { %947 = vst [vmem:[#allocation8 + $0x40] sm:$0xff] %v915_v23  ;;  %v916_v49 = vmul.f32 %v1292_v24, %v783_v26 }
 0x2b9   :  { %950 = vst [vmem:[#allocation8 + $0x58] sm:$0xff] %v918_v60 }
 0x2ba   :  { %948 = vst [vmem:[#allocation8 + $0x48] sm:$0xff] %v916_v49  ;;  %v1326_v23 = vpop.eup %1325 }
 0x2bb   :  { %v1328_v24 = vpop.eup %1327 }
 0x2bc   :  { %v1147_v28 = vpop.f32.mrb[12].mxu1  ;;  %v1330_v26 = vpop.eup %1329 }
 0x2bd   :  { %v921_v30 = vmul.f32 %v1294_v62, %v1147_v28  ;;  %v796_v32 = vpop.f32.mrb[13].mxu1  ;;  %v1332_v62 = vpop.eup %1331 }
 0x2be   :  { %v919_v47 = vmul.f32 %v1296_v29, %v796_v32  ;;  %v1148_v34 = vpop.f32.mrb[14].mxu1 }
 0x2bf   :  { %953 = vst [vmem:[#allocation8 + $0x70] sm:$0xff] %v921_v30  ;;  %v922_v33 = vmul.f32 %v1298_v31, %v1148_v34  ;;  %v799_v50 = vpop.f32.mrb[15].mxu1 }
 0x2c0   :  { %951 = vst [vmem:[#allocation8 + $0x60] sm:$0xff] %v919_v47  ;;  %v920_v42 = vmul.f32 %v1300_v36, %v799_v50 }
 0x2c1   :  { %954 = vst [vmem:[#allocation8 + $0x78] sm:$0xff] %v922_v33 }
 0x2c2   :  { %952 = vst [vmem:[#allocation8 + $0x68] sm:$0xff] %v920_v42 }
 0x2c4   :  { %v1151_v48 = vpop.f32.mrb[16].mxu1 }
 0x2c5   :  { %v925_v1 = vmul.f32 %v1302_v37, %v1151_v48  ;;  %v812_v39 = vpop.f32.mrb[17].mxu1 }
 0x2c6   :  { %v923_v2 = vmul.f32 %v1304_v53, %v812_v39  ;;  %v1152_v3 = vpop.f32.mrb[18].mxu1 }
 0x2c7   :  { %957 = vst [vmem:[#allocation8 + $0x90] sm:$0xff] %v925_v1  ;;  %v926_v52 = vmul.f32 %v1306_v55, %v1152_v3  ;;  %v815_v5 = vpop.f32.mrb[19].mxu1 }
 0x2c8   :  { %955 = vst [vmem:[#allocation8 + $0x80] sm:$0xff] %v923_v2  ;;  %v924_v6 = vmul.f32 %v1308_v4, %v815_v5 }
 0x2c9   :  { %958 = vst [vmem:[#allocation8 + $0x98] sm:$0xff] %v926_v52 }
 0x2ca   :  { %956 = vst [vmem:[#allocation8 + $0x88] sm:$0xff] %v924_v6 }
 0x2cc   :  { %v1155_v8 = vpop.f32.mrb[20].mxu1 }
 0x2cd   :  { %v929_v9 = vmul.f32 %v1310_v54, %v1155_v8  ;;  %v828_v10 = vpop.f32.mrb[21].mxu1 }
 0x2ce   :  { %v927_v11 = vmul.f32 %v1312_v38, %v828_v10  ;;  %v1156_v12 = vpop.f32.mrb[22].mxu1 }
 0x2cf   :  { %961 = vst [vmem:[#allocation8 + $0xb0] sm:$0xff] %v929_v9  ;;  %v930_v13 = vmul.f32 %v1314_v57, %v1156_v12  ;;  %v831_v14 = vpop.f32.mrb[23].mxu1 }
 0x2d0   :  { %959 = vst [vmem:[#allocation8 + $0xa0] sm:$0xff] %v927_v11  ;;  %v928_v15 = vmul.f32 %v1316_v43, %v831_v14 }
 0x2d1   :  { %962 = vst [vmem:[#allocation8 + $0xb8] sm:$0xff] %v930_v13 }
 0x2d2   :  { %960 = vst [vmem:[#allocation8 + $0xa8] sm:$0xff] %v928_v15 }
 0x2d4   :  { %v1159_v16 = vpop.f32.mrb[24].mxu1 }
 0x2d5   :  { %v933_v58 = vmul.f32 %v1318_v45, %v1159_v16  ;;  %v844_v18 = vpop.f32.mrb[25].mxu1 }
 0x2d6   :  { %v931_v19 = vmul.f32 %v1320_v17, %v844_v18  ;;  %v1160_v20 = vpop.f32.mrb[26].mxu1 }
 0x2d7   :  { %965 = vst [vmem:[#allocation8 + $0xd0] sm:$0xff] %v933_v58  ;;  %v934_v61 = vmul.f32 %v1322_v41, %v1160_v20  ;;  %v847_v22 = vpop.f32.mrb[27].mxu1 }
 0x2d8   :  { %963 = vst [vmem:[#allocation8 + $0xc0] sm:$0xff] %v931_v19  ;;  %v932_v44 = vmul.f32 %v1324_v21, %v847_v22 }
 0x2d9   :  { %966 = vst [vmem:[#allocation8 + $0xd8] sm:$0xff] %v934_v61 }
 0x2da   :  { %964 = vst [vmem:[#allocation8 + $0xc8] sm:$0xff] %v932_v44 }
 0x2dc   :  { %v1163_v63 = vpop.f32.mrb[28].mxu1 }
 0x2dd   :  { %v937_v25 = vmul.f32 %v1326_v23, %v1163_v63  ;;  %v860_v60 = vpop.f32.mrb[29].mxu1 }
 0x2de   :  { %v935_v49 = vmul.f32 %v1328_v24, %v860_v60  ;;  %v1164_v27 = vpop.f32.mrb[30].mxu1 }
 0x2df   :  { %969 = vst [vmem:[#allocation8 + $0xf0] sm:$0xff] %v937_v25  ;;  %v938_v28 = vmul.f32 %v1330_v26, %v1164_v27  ;;  %v863_v29 = vpop.f32.mrb[31].mxu1 }
 0x2e0   :  { %967 = vst [vmem:[#allocation8 + $0xe0] sm:$0xff] %v935_v49  ;;  %v936_v51 = vmul.f32 %v1332_v62, %v863_v29 }
 0x2e1   :  { %970 = vst [vmem:[#allocation8 + $0xf8] sm:$0xff] %v938_v28 }
 0x2e2   :  { %968 = vst [vmem:[#allocation8 + $0xe8] sm:$0xff] %v936_v51 }
 0x2e3   :  { %1410 = shalt.err (!%p1407_p0)
}
 0x2e4   :  { %s1411_s25 = scalar_lea.hbm %s1650_s3, 4096 }
 0x2e5   :  { %p1412_p1 = scmp.ne.s32.totalorder %s1650_s3, %s1411_s25  ;;  %p1415_p2 = scmp.lt.u32.totalorder %s1411_s25, %s1650_s3 }
 0x2e7   :  { %p1417_p3 = pnand %p1415_p2, %p1412_p1 }
 0x2e9   :  { %1420 = shalt.err (!%p1417_p3)
}
 0x2ea   :  { %s1433_s30 = smov 128   ;;  %s1434_s4 = smov 8  }
 0x2eb   :  { %982 = dma.vmem_to_hbm [thread:$0]  %s977_s21, 4096, %s1650_s3, [#allocation4], %s1433_s30, %s1433_s30, %s1434_s4  }
 0x2ec   :  { %1425 = dma.done.wait [#allocation4], 4096  }
 0x2ed   :  { %1426 = vsyncadd [#allocation4], 4294963200 }
 0x2ee   :  { %986 = vsyncpa [#allocation3], 1 }
 0x2ef   :  { %987 = vsyncpa [#allocation6], 1 }
 0x2f0   :  { %988 = vsyncpa [#allocation4], 1 }

</bundles_post_ra>
